<compile_context>
chip_gen: v6e
topology: v6e:2x2x1
jax: 0.10.0
libtpu: 0.0.40
codegen_flags: <defaults>
</compile_context>

<pallas_src>
import jax
import jax.numpy as jnp
from jax.experimental import pallas as pl
from jax.experimental.pallas import tpu as pltpu


_MASK_VALUE = float(jnp.finfo(jnp.float32).min)  # matches torch.finfo(f32).min


def _fit(dim, pref):
    """Use tile `pref` if it evenly divides `dim`, else fall back to full dim."""
    if dim >= pref and dim % pref == 0:
        return pref
    return dim


# --------------------------------------------------------------------------
# Fused (per-replica) linear: out[r] = x[r] @ w[r] (+ b[r])
# --------------------------------------------------------------------------
def _linear_bias_kernel(x_ref, w_ref, b_ref, o_ref, acc_ref):
    k = pl.program_id(3)

    @pl.when(k == 0)
    def _():
        acc_ref[...] = jnp.zeros_like(acc_ref)

    acc_ref[...] += jnp.dot(x_ref[0], w_ref[0],
                            preferred_element_type=jnp.float32)

    @pl.when(k == pl.num_programs(3) - 1)
    def _():
        out = acc_ref[...] + b_ref[0][None, :].astype(jnp.float32)
        o_ref[0] = out.astype(o_ref.dtype)


def _linear_nobias_kernel(x_ref, w_ref, o_ref, acc_ref):
    k = pl.program_id(3)

    @pl.when(k == 0)
    def _():
        acc_ref[...] = jnp.zeros_like(acc_ref)

    acc_ref[...] += jnp.dot(x_ref[0], w_ref[0],
                            preferred_element_type=jnp.float32)

    @pl.when(k == pl.num_programs(3) - 1)
    def _():
        o_ref[0] = acc_ref[...].astype(o_ref.dtype)


def fused_linear(x, w, b=None, *, tt=256, tn=512, tk=512):
    """x: [B, T, Hin], w: [B, Hin, Hout], b: [B, Hout] or None -> [B, T, Hout]."""
    B, T, Hi = x.shape
    Ho = w.shape[-1]
    TT, TN, TK = _fit(T, tt), _fit(Ho, tn), _fit(Hi, tk)
    grid = (B, T // TT, Ho // TN, Hi // TK)

    x_spec = pl.BlockSpec((1, TT, TK), lambda r, t, n, k: (r, t, k))
    w_spec = pl.BlockSpec((1, TK, TN), lambda r, t, n, k: (r, k, n))
    o_spec = pl.BlockSpec((1, TT, TN), lambda r, t, n, k: (r, t, n))

    itemsize = jnp.dtype(x.dtype).itemsize
    cost = pl.CostEstimate(
        flops=2 * B * T * Hi * Ho,
        transcendentals=0,
        bytes_accessed=(x.size + w.size + B * T * Ho
                        + (b.size if b is not None else 0)) * itemsize,
    )

    if b is not None:
        kernel = _linear_bias_kernel
        in_specs = [x_spec, w_spec,
                    pl.BlockSpec((1, TN), lambda r, t, n, k: (r, n))]
        args = (x, w, b)
    else:
        kernel = _linear_nobias_kernel
        in_specs = [x_spec, w_spec]
        args = (x, w)

    return pl.pallas_call(
        kernel,
        out_shape=jax.ShapeDtypeStruct((B, T, Ho), x.dtype),
        grid_spec=pltpu.PrefetchScalarGridSpec(
            num_scalar_prefetch=0,
            grid=grid,
            in_specs=in_specs,
            out_specs=o_spec,
            scratch_shapes=[pltpu.VMEM((TT, TN), jnp.float32)],
        ),
        compiler_params=pltpu.CompilerParams(
            dimension_semantics=("parallel", "parallel", "parallel", "arbitrary"),
            vmem_limit_bytes=32 * 1024 * 1024,
        ),
        cost_estimate=cost,
    )(*args)


# --------------------------------------------------------------------------
# Causal flash attention (GPT-Neo recipe: f32 QK^T, finfo.min mask, no scaling)
# --------------------------------------------------------------------------
def _flash_attn_kernel(q_ref, k_ref, v_ref, o_ref, m_ref, l_ref, acc_ref):
    qi = pl.program_id(2)
    ki = pl.program_id(3)
    TQ = q_ref.shape[2]
    TK = k_ref.shape[2]

    @pl.when(ki == 0)
    def _():
        m_ref[...] = jnp.full_like(m_ref, -jnp.inf)
        l_ref[...] = jnp.zeros_like(l_ref)
        acc_ref[...] = jnp.zeros_like(acc_ref)

    # Skip kv blocks that lie entirely in the causally-masked future.
    @pl.when(ki * TK <= qi * TQ + (TQ - 1))
    def _():
        # GPT-Neo upcasts query/key to f32 before QK^T (no 1/sqrt(d) scaling).
        q = q_ref[0, 0].astype(jnp.float32)
        k = k_ref[0, 0].astype(jnp.float32)
        s = jax.lax.dot_general(q, k, (((1,), (1,)), ((), ())),
                                preferred_element_type=jnp.float32)  # (TQ, TK)

        row = jax.lax.broadcasted_iota(jnp.int32, (TQ, TK), 0) + qi * TQ
        col = jax.lax.broadcasted_iota(jnp.int32, (TQ, TK), 1) + ki * TK
        s = jnp.where(col <= row, s, _MASK_VALUE)

        m_prev = m_ref[...]
        m_new = jnp.maximum(m_prev, s.max(axis=-1, keepdims=True))
        alpha = jnp.exp(m_prev - m_new)
        p = jnp.exp(s - m_new)
        l_ref[...] = alpha * l_ref[...] + p.sum(axis=-1, keepdims=True)
        acc_ref[...] = alpha * acc_ref[...] + jnp.dot(
            p.astype(v_ref.dtype), v_ref[0, 0],
            preferred_element_type=jnp.float32)
        m_ref[...] = m_new

    @pl.when(ki == pl.num_programs(3) - 1)
    def _():
        o_ref[0, 0] = (acc_ref[...] / l_ref[...]).astype(o_ref.dtype)


def flash_attention(q, k, v, *, tq=256, tkv=256):
    """q/k/v: [BN, NH, S, D] -> causal attention output [BN, NH, S, D]."""
    BN, NH, S, D = q.shape
    TQ = _fit(S, tq)
    TKV = _fit(S, tkv)
    grid = (BN, NH, S // TQ, S // TKV)

    q_spec = pl.BlockSpec((1, 1, TQ, D), lambda b, h, qi, ki: (b, h, qi, 0))
    k_spec = pl.BlockSpec((1, 1, TKV, D), lambda b, h, qi, ki: (b, h, ki, 0))
    v_spec = pl.BlockSpec((1, 1, TKV, D), lambda b, h, qi, ki: (b, h, ki, 0))
    o_spec = pl.BlockSpec((1, 1, TQ, D), lambda b, h, qi, ki: (b, h, qi, 0))

    itemsize = jnp.dtype(q.dtype).itemsize
    cost = pl.CostEstimate(
        flops=4 * BN * NH * S * S * D,
        transcendentals=BN * NH * S * S,
        bytes_accessed=4 * BN * NH * S * D * itemsize,
    )

    return pl.pallas_call(
        _flash_attn_kernel,
        out_shape=jax.ShapeDtypeStruct((BN, NH, S, D), q.dtype),
        grid_spec=pltpu.PrefetchScalarGridSpec(
            num_scalar_prefetch=0,
            grid=grid,
            in_specs=[q_spec, k_spec, v_spec],
            out_specs=o_spec,
            scratch_shapes=[
                pltpu.VMEM((TQ, 1), jnp.float32),   # running max m
                pltpu.VMEM((TQ, 1), jnp.float32),   # running sum l
                pltpu.VMEM((TQ, D), jnp.float32),   # output accumulator
            ],
        ),
        compiler_params=pltpu.CompilerParams(
            dimension_semantics=("parallel", "parallel", "parallel", "arbitrary"),
            vmem_limit_bytes=32 * 1024 * 1024,
        ),
        cost_estimate=cost,
    )(q, k, v)


# --------------------------------------------------------------------------
# Full GPTNeoSelfAttention forward (global causal, eval mode)
# --------------------------------------------------------------------------
def gpt_neo_self_attention(hidden_states, wq, wk, wv, wo, bo, num_heads):
    B, N, S, H = hidden_states.shape
    D = H // num_heads

    x2 = hidden_states.reshape(B, N * S, H)
    q = fused_linear(x2, wq)          # q_proj (no bias)
    k = fused_linear(x2, wk)          # k_proj (no bias)
    v = fused_linear(x2, wv)          # v_proj (no bias)

    def split_heads(t):
        t = t.reshape(B, N, S, num_heads, D).transpose(0, 1, 3, 2, 4)
        return t.reshape(B * N, num_heads, S, D)

    attn = flash_attention(split_heads(q), split_heads(k), split_heads(v))

    attn = (attn.reshape(B, N, num_heads, S, D)
                .transpose(0, 1, 3, 2, 4)
                .reshape(B, N * S, H))
    out = fused_linear(attn, wo, bo)  # out_proj (+bias)
    # attn_dropout / resid_dropout: identity in eval mode -> no-op.
    return out.reshape(B, N, S, H)


# --------------------------------------------------------------------------
# Pure-JAX reference
# --------------------------------------------------------------------------
def reference_self_attention(x, wq, wk, wv, wo, bo, num_heads):
    B, N, S, H = x.shape
    D = H // num_heads
    q = jnp.einsum("bnsh,bhe->bnse", x, wq)
    k = jnp.einsum("bnsh,bhe->bnse", x, wk)
    v = jnp.einsum("bnsh,bhe->bnse", x, wv)

    def split(t):
        return t.reshape(B, N, S, num_heads, D).transpose(0, 1, 3, 2, 4)

    qh, kh, vh = split(q), split(k), split(v)
    s = jnp.einsum("bnhqd,bnhkd->bnhqk",
                   qh.astype(jnp.float32), kh.astype(jnp.float32))
    causal = jnp.tril(jnp.ones((S, S), dtype=bool))
    s = jnp.where(causal, s, jnp.finfo(jnp.float32).min)
    p = jax.nn.softmax(s, axis=-1).astype(vh.dtype)
    o = jnp.einsum("bnhqk,bnhkd->bnhqd", p, vh)
    o = o.transpose(0, 1, 3, 2, 4).reshape(B, N, S, H)
    return jnp.einsum("bnsh,bhe->bnse", o, wo) + bo[:, None, None, :]


if __name__ == "__main__":
    B = 2          # fused model replicas (fnn.Linear B)
    N = 2          # batch
    S = 8          # sequence length
    H = 32         # config.hidden_size
    NH = 4         # config.num_heads -> head_dim = 8

    key = jax.random.PRNGKey(0)
    kx, kq, kk, kv, ko, kb = jax.random.split(key, 6)
    x = jax.random.normal(kx, (B, N, S, H), dtype=jnp.float32)
    wq = jax.random.normal(kq, (B, H, H), dtype=jnp.float32) * 0.02
    wk = jax.random.normal(kk, (B, H, H), dtype=jnp.float32) * 0.02
    wv = jax.random.normal(kv, (B, H, H), dtype=jnp.float32) * 0.02
    wo = jax.random.normal(ko, (B, H, H), dtype=jnp.float32) * 0.02
    bo = jax.random.normal(kb, (B, H), dtype=jnp.float32) * 0.02

    out = gpt_neo_self_attention(x, wq, wk, wv, wo, bo, NH)
    out = jax.block_until_ready(out)

    ref = reference_self_attention(x, wq, wk, wv, wo, bo, NH)
    assert out.shape == (B, N, S, H)
    assert jnp.allclose(out, ref, atol=2e-4, rtol=2e-4), "mismatch vs reference"
    print("KERNEL_OK")
</pallas_src>

<mosaic_0001>
module attributes {stable_mosaic.version = 11 : i64} {
  func.func @_linear_nobias_kernel(%arg0: i32, %arg1: i32, %arg2: i32, %arg3: i32, %arg4: memref<1x16x32xf32, #tpu.memory_space<vmem>>, %arg5: memref<1x32x32xf32, #tpu.memory_space<vmem>>, %arg6: memref<1x16x32xf32, #tpu.memory_space<vmem>>, %arg7: memref<16x32xf32, #tpu.memory_space<vmem>>) attributes {dimension_semantics = [#tpu.dimension_semantics<parallel>, #tpu.dimension_semantics<parallel>, #tpu.dimension_semantics<parallel>, #tpu.dimension_semantics<arbitrary>], iteration_bounds = array<i64: 2, 1, 1, 1>, scalar_prefetch = 0 : i64, scratch_operands = 1 : i64, tpu.core_type = #tpu.core_type<tc>, window_params = [{transform_indices = @transform_0, window_bounds = array<i64: 1, 16, 32>}, {transform_indices = @transform_1, window_bounds = array<i64: 1, 32, 32>}, {transform_indices = @transform_2, window_bounds = array<i64: 1, 16, 32>}]} {
    %c0_i32 = arith.constant 0 : i32
    %0 = arith.cmpi eq, %arg3, %c0_i32 : i32
    %1 = arith.extui %0 : i1 to i32
    %c0_i32_0 = arith.constant 0 : i32
    %2 = arith.cmpi ne, %1, %c0_i32_0 : i32
    scf.if %2 {
      %cst_12 = arith.constant 0.000000e+00 : f32
      %14 = vector.broadcast %cst_12 : f32 to vector<16x32xf32>
      %c0_13 = arith.constant 0 : index
      %c0_14 = arith.constant 0 : index
      %15 = vector.load %arg7[%c0_13, %c0_14] : memref<16x32xf32, #tpu.memory_space<vmem>>, vector<16x32xf32>
      tpu.vector_store %arg7[%c0_13, %c0_14], %14 {strides = array<i32>} : memref<16x32xf32, #tpu.memory_space<vmem>>, vector<16x32xf32>,
    } else {
    }
    %c0 = arith.constant 0 : index
    %c0_1 = arith.constant 0 : index
    %3 = vector.load %arg7[%c0, %c0_1] : memref<16x32xf32, #tpu.memory_space<vmem>>, vector<16x32xf32>
    %c0_2 = arith.constant 0 : index
    %c0_3 = arith.constant 0 : index
    %c0_4 = arith.constant 0 : index
    %4 = vector.load %arg4[%c0_2, %c0_3, %c0_4] : memref<1x16x32xf32, #tpu.memory_space<vmem>>, vector<1x16x32xf32>
    %5 = vector.shape_cast %4 : vector<1x16x32xf32> to vector<16x32xf32>
    %c0_5 = arith.constant 0 : index
    %c0_6 = arith.constant 0 : index
    %c0_7 = arith.constant 0 : index
    %6 = vector.load %arg5[%c0_5, %c0_6, %c0_7] : memref<1x32x32xf32, #tpu.memory_space<vmem>>, vector<1x32x32xf32>
    %7 = vector.shape_cast %6 : vector<1x32x32xf32> to vector<32x32xf32>
    %cst = arith.constant dense<0.000000e+00> : vector<16x32xf32>
    %8 = tpu.matmul %5, %7, %cst {dimension_numbers = #tpu.dot_dimension_numbers<[1], [0], [0], [1], [0, 0, 1, 1], [], []>} : vector<16x32xf32>, vector<32x32xf32>, vector<16x32xf32> -> vector<16x32xf32>
    %9 = arith.addf %3, %8 : vector<16x32xf32>
    %c0_8 = arith.constant 0 : index
    %c0_9 = arith.constant 0 : index
    %10 = vector.load %arg7[%c0_8, %c0_9] : memref<16x32xf32, #tpu.memory_space<vmem>>, vector<16x32xf32>
    tpu.vector_store %arg7[%c0_8, %c0_9], %9 {strides = array<i32>} : memref<16x32xf32, #tpu.memory_space<vmem>>, vector<16x32xf32>,
    %c0_i32_10 = arith.constant 0 : i32
    %11 = arith.cmpi eq, %arg3, %c0_i32_10 : i32
    %12 = arith.extui %11 : i1 to i32
    %c0_i32_11 = arith.constant 0 : i32
    %13 = arith.cmpi ne, %12, %c0_i32_11 : i32
    scf.if %13 {
      %c0_12 = arith.constant 0 : index
      %c0_13 = arith.constant 0 : index
      %14 = vector.load %arg7[%c0_12, %c0_13] : memref<16x32xf32, #tpu.memory_space<vmem>>, vector<16x32xf32>
      %c0_14 = arith.constant 0 : index
      %c0_15 = arith.constant 0 : index
      %c0_16 = arith.constant 0 : index
      %15 = vector.load %arg6[%c0_14, %c0_15, %c0_16] : memref<1x16x32xf32, #tpu.memory_space<vmem>>, vector<1x16x32xf32>
      %16 = vector.shape_cast %15 : vector<1x16x32xf32> to vector<16x32xf32>
      %17 = vector.shape_cast %14 : vector<16x32xf32> to vector<1x16x32xf32>
      tpu.vector_store %arg6[%c0_14, %c0_15, %c0_16], %17 {strides = array<i32>} : memref<1x16x32xf32, #tpu.memory_space<vmem>>, vector<1x16x32xf32>,
    } else {
    }
    return
  }
  func.func @transform_0(%arg0: i32, %arg1: i32, %arg2: i32, %arg3: i32) -> (i32, i32, i32) {
    %c0_i32 = arith.constant 0 : i32
    return %arg0, %arg1, %arg3 : i32, i32, i32
  }
  func.func @transform_1(%arg0: i32, %arg1: i32, %arg2: i32, %arg3: i32) -> (i32, i32, i32) {
    %c0_i32 = arith.constant 0 : i32
    return %arg0, %arg3, %arg2 : i32, i32, i32
  }
  func.func @transform_2(%arg0: i32, %arg1: i32, %arg2: i32, %arg3: i32) -> (i32, i32, i32) {
    %c0_i32 = arith.constant 0 : i32
    return %arg0, %arg1, %arg2 : i32, i32, i32
  }
}

</mosaic_0001>

<bundles_post_ra>
// kernel: tpu_custom_call.1
= control target key start
LH: loop header
LB: loop body
LE: loop exit
PB: predicated region body
PF: predicated region fallthrough
CT: control target
= control target key end

     0   :  { %7 = vsyncpa [#allocation4], 0  ;;  %s962_s0 = inlined_call_operand.hbm [shape: f32[2,16,32], index: 0, kind: input, shape index: {}]   ;;  %s963_s1 = inlined_call_operand.hbm [shape: f32[2,32,32], index: 1, kind: input, shape index: {}]   ;;  %s964_s2 = inlined_call_operand.hbm [shape: f32[2,16,32], index: 2, kind: output, shape index: {}]  }
   0x1   :  { %9 = vsyncpa [#allocation4 + $0x1], 0 }
   0x2   :  { %10 = vsyncpa [#allocation7], 0 }
   0x3   :  { %12 = vsyncpa [#allocation7 + $0x1], 0 }
   0x4   :  { %13 = vsyncpa [#allocation5], 0 }
   0x5   :  { %15 = vsyncpa [#allocation5 + $0x1], 0  ;;  %s774_s9 = smov 0   ;;  %s776_s10 = smov 0  }
   0x6   :  { %s778_s11 = smov 0   ;;  %s780_s12 = smov 0  }
   0x7   :  { %s782_s13 = smov 0   ;;  %s784_s14 = smov 0  }
   0x8 LB: > { %s496_s15 = sadd.s32 4294967295, %s749_s14   ;;  %s497_s16 = sadd.s32 4294967294, %s749_s14   ;;  %s749_s14 = sphi %s784_s14, %s21_s14   ;;  %s745_s13 = sphi %s782_s13, %s975_s13   ;;  %s741_s12 = sphi %s780_s12, %s974_s12   ;;  %s737_s11 = sphi %s778_s11, %s973_s11   ;;  %s733_s10 = sphi %s776_s10, %s972_s10   ;;  %s729_s9 = sphi %s774_s9, %s971_s9  }
   0x9   : > { %s47_s17 = sadd.s32 1, %s745_s13  ;;  %s58_s18 = sadd.s32 1, %s737_s11 }
   0xa   : > { %p49_p0 = scmp.ge.s32.totalorder %s47_s17, 2  ;;  %p65_p1 = scmp.ne.s32.totalorder %s737_s11, %s733_s10 }
   0xb   : > { %p66_p2 = scmp.eq.s32.totalorder %s749_s14, 0  ;;  %p71_p3 = scmp.ne.s32.totalorder %s733_s10, %s729_s9 }
   0xc   : > { %s977_s17 = smov (%p49_p0, %s47_s17), 0  ;;  %p72_p5 = scmp.eq.s32.totalorder %s496_s15, 0 }
   0xd   : > { %p815_p4 = por %p66_p2, %p65_p1  ;;  %s51_s20 = ssub.s32 %s745_s13, %s977_s17 }
   0xe   : > { %p129_p6 = scmp.eq.s32.totalorder %s496_s15, 1  ;;  %p56_p7 = scmp.eq.s32.totalorder %s51_s20, 0 }
   0xf   : > { %p821_p8 = por %p72_p5, %p71_p3  ;;  %p135_p10 = scmp.eq.s32.totalorder %s497_s16, 1 }
  0x10   : > { %p825_p9 = por %p129_p6, %p65_p1  ;;  %p499_p12 = scmp.ge.s32.totalorder %s749_s14, 2 }
  0x11   : > { %s830_s23 = scalar_select %p56_p7, %s737_s11, %s58_s18  }
  0x12   : > { %p832_p11 = por %p135_p10, %p71_p3  ;;  %p554_p13 = scmp.lt.s32.totalorder %s749_s14, 2 }
  0x13   : > { %s839_s25 = sand.u32 1, %s737_s11   ;;  %s517_s27 = sshll.u32 %s745_s13, 8 }
  0x14   : > { %s500_s26 = sshll.u32 %s839_s25, 4  ;;  %s168_s30 = scalar_lea.hbm %s962_s0, %s517_s27 }
  0x15   : > { %s159_s3 = scalar_lea.vmem [#allocation3], %s500_s26  ;;  %p848_p0 = pnand %p554_p13, %p815_p4 }
  0x16   : > { %s169_s4 = sshll.u32 %s159_s3, 4  ;;  %p506_p1 = scmp.ge.s32.totalorder %s749_s14, 1  ;;  %s170_s4 = int_to_ptr.vmem [resolvable:$true] %s169_s4 }
  0x17   : > { %s156_s6 = scalar_lea.sflag [#allocation4], %s839_s25  ;;  %p611_p2 = pneg %p848_p0 }
  0x18   : > { %s622_s7 = scalar_lea.vmem %s170_s4, 256  ;;  %s751_s8 = smov [#allocation3]  }
  0x19   : > { %p623_p3 = scmp.ne.s32.totalorder %s170_s4, %s622_s7  ;;  %s627_s15 = sshll.u32 %s751_s8, 4  ;;  %s628_s15 = int_to_ptr.vmem [resolvable:$false] %s627_s15 }
  0x1a   : > { %s629_s16 = scalar_lea.vmem %s628_s15, 512  ;;  %p630_p4 = scmp.lt.s32.totalorder %s170_s4, %s628_s15 }
  0x1b   : > { %p625_p5 = pnand %p623_p3, %p611_p2  ;;  %p631_p7 = scmp.lt.s32.totalorder %s629_s16, %s622_s7 }
  0x1d   : > { %p626_p6 = pneg %p625_p5  ;;  %p632_p10 = por %p631_p7, %p630_p4 }
  0x1f   : > { %p633_p13 = pnand %p632_p10, %p626_p6 }
  0x21   : > { %636 = shalt.err (!%p633_p13)
}
  0x22   : > { %s752_s18 = smov 128   ;;  %s753_s19 = smov 8  }
  0x23   : > { %546 = dma.hbm_to_vmem [thread:$0]  (!%p848_p0), %s168_s30, 256, %s170_s4, %s156_s6, %s752_s18, %s752_s18, %s753_s19  }
  0x24   : > { %p201_p3 = scmp.lt.s32.totalorder %s749_s14, 3  ;;  %s503_s20 = sshll.u32 %s839_s25, 5 }
  0x25   : > { %s518_s26 = sshll.u32 %s745_s13, 9  ;;  %s183_s7 = scalar_lea.vmem [#allocation6], %s503_s20 }
  0x26   : > { %p866_p5 = pnand %p506_p1, %p201_p3  ;;  %s192_s3 = scalar_lea.hbm %s963_s1, %s518_s26 }
  0x27   : > { %s193_s8 = sshll.u32 %s183_s7, 4  ;;  %s180_s15 = scalar_lea.sflag [#allocation7], %s839_s25  ;;  %s194_s8 = int_to_ptr.vmem [resolvable:$true] %s193_s8 }
  0x28   : > { %s650_s16 = scalar_lea.vmem %s194_s8, 512  ;;  %s754_s30 = smov [#allocation6]  }
  0x29   : > { %p651_p6 = scmp.ne.s32.totalorder %s194_s8, %s650_s16  ;;  %s655_s4 = sshll.u32 %s754_s30, 4  ;;  %s656_s4 = int_to_ptr.vmem [resolvable:$false] %s655_s4 }
  0x2a   : > { %s657_s6 = scalar_lea.vmem %s656_s4, 1024  ;;  %p658_p1 = scmp.lt.s32.totalorder %s194_s8, %s656_s4 }
  0x2b   : > { %p653_p4 = pnand %p651_p6, %p611_p2  ;;  %p659_p10 = scmp.lt.s32.totalorder %s657_s6, %s650_s16 }
  0x2d   : > { %p654_p7 = pneg %p653_p4  ;;  %p660_p13 = por %p659_p10, %p658_p1 }
  0x2f   : > { %p661_p3 = pnand %p660_p13, %p654_p7 }
  0x31   : > { %664 = shalt.err (!%p661_p3)
}
  0x32   : > { %549 = dma.hbm_to_vmem [thread:$0]  (!%p848_p0), %s192_s3, 512, %s194_s8, %s180_s15, %s752_s18, %s752_s18, %s753_s19  }
  0x33   : > { %205 = sbr.rel (%p866_p5) target bundleno = 288 (0x120), region = 28  ;;  %s882_s25 = sand.u32 (!%p866_p5), 1, %s733_s10  }
  0x34   : > { %s507_s20 = sshll.u32 (!%p866_p5), %s882_s25, 4  ;;  %s208_s26 = scalar_lea.sflag (!%p866_p5), [#allocation4], %s882_s25 }
  0x35   : > { %s211_s28 = scalar_lea.vmem (!%p866_p5), [#allocation3], %s507_s20 }
  0x38   : > { %716 = dma.done.wait (%p821_p8), %s208_s26, 256  }
  0x39   : > { %718 = vsyncadd (%p821_p8), %s208_s26, 4294967040  ;;  %s508_s5 = sshll.u32 %s882_s25, 5  ;;  %s217_s18 = scalar_lea.sflag [#allocation7], %s882_s25 }
  0x3a   : > { %s220_s19 = scalar_lea.vmem [#allocation6], %s508_s5 }
  0x3b   : > { %720 = dma.done.wait (%p821_p8), %s217_s18, 512  }
  0x3c   : > { %722 = vsyncadd (%p821_p8), %s217_s18, 4294966784  ;;  %vm253_vm0 = vcmask 261120   ;;  %v755_v0 = vmov 0.0   ;;  %v263_v1 = vld [vmem:[%s220_s19 + $0x18] sm:$0xff]  ;;  %v262_v2 = vld [vmem:[%s220_s19 + $0x10] sm:$0xff]  ;;  %s519_s21 = sshll.u32 %s741_s12, 8 }
  0x3d   : > { %255 = vst.msk [vmem:[#allocation2 + $0x8] sm:$0xff] %vm253_vm0, %v755_v0  ;;  %254 = vst.msk [vmem:[#allocation2] sm:$0xff] %vm253_vm0, %v755_v0  ;;  %526 = vmatprep.subr.mxu0 %v263_v1  ;;  %v258_v3 = vld [vmem:[%s211_s28] sm:$0xff]  ;;  %v261_v4 = vld [vmem:[%s220_s19 + $0x8] sm:$0xff]  ;;  %s245_s27 = scalar_lea.vmem [#allocation8], %s507_s20  ;;  %s910_s8 = scalar_lea.hbm %s964_s2, %s519_s21 }
  0x3e   : > { %527 = vmatpush3.msra.mxu0 %v263_v1  ;;  %534 = vmatprep.mubr.msk.f32.mxu0 %vm253_vm0, %v258_v3  ;;  %v260_v5 = vld [vmem:[%s220_s19] sm:$0xff]  ;;  %v259_v6 = vld [vmem:[%s211_s28 + $0x8] sm:$0xff]  ;;  %s374_s29 = sshll.u32 %s245_s27, 4  ;;  %s358_s12 = scalar_lea.sflag [#allocation5], %s882_s25  ;;  %s912_s29 = int_to_ptr.vmem [resolvable:$true] %s374_s29 }
  0x3f   : > { %528 = vmatprep.subr.mxu0 %v262_v2  ;;  %s665_s15 = scalar_lea.vmem %s912_s29, 256  ;;  %s756_s16 = smov [#allocation8]  }
  0x40   : > { %529 = vmatpush3.msra.mxu0 %v262_v2  ;;  %p666_p8 = scmp.ne.s32.totalorder %s912_s29, %s665_s15  ;;  %s669_s30 = sshll.u32 %s756_s16, 4  ;;  %s670_s30 = int_to_ptr.vmem [resolvable:$false] %s669_s30 }
  0x41   : > { %530 = vmatprep.subr.mxu0 %v261_v4  ;;  %s671_s4 = scalar_lea.vmem %s670_s30, 512  ;;  %p672_p5 = scmp.lt.s32.totalorder %s912_s29, %s670_s30 }
  0x42   : > { %531 = vmatpush3.msra.mxu0 %v261_v4  ;;  %p667_p0 = pnand %p666_p8, %p825_p9  ;;  %p673_p6 = scmp.lt.s32.totalorder %s671_s4, %s665_s15 }
  0x43   : > { %532 = vmatprep.subr.mxu0 %v260_v5 }
  0x44   : > { %533 = vmatpush3.msra.mxu0 %v260_v5  ;;  %v257_v7 = vld [vmem:[#allocation2 + $0x8] sm:$0xff]  ;;  %v256_v9 = vld [vmem:[#allocation2] sm:$0xff]  ;;  %p668_p2 = pneg %p667_p0  ;;  %p674_p4 = por %p673_p6, %p672_p5 }
  0x45   : > { %535 = vmatmul.mubr.msk.f32.vlgmr.msra.gmra.mxu0 %vm253_vm0, %v259_v6 }
  0x46   : > { %p675_p7 = pnand %p674_p4, %p668_p2 }
 0x105   : > { %v536_v8 = vpop.f32.mrf.mxu0 }
 0x106   : > { %v347_v10 = vadd.f32 %v536_v8, %v257_v7 }
 0x107   : > { %v337_v11 = vpop.f32.mrf.mxu0 }
 0x108   : > { %349 = vst.msk [vmem:[#allocation2 + $0x8] sm:$0xff] %vm253_vm0, %v347_v10  ;;  %v346_v12 = vadd.f32 %v337_v11, %v256_v9 }
 0x10a   : > { %348 = vst.msk [vmem:[#allocation2] sm:$0xff] %vm253_vm0, %v346_v12 }
 0x10f   : > { %v354_v13 = vld [vmem:[#allocation2 + $0x8] sm:$0xff] }
 0x110   : > { %356 = vst.msk [vmem:[%s245_s27 + $0x8] sm:$0xff] %vm253_vm0, %v354_v13 }
 0x111   : > { %v353_v14 = vld [vmem:[#allocation2] sm:$0xff] }
 0x112   : > { %355 = vst.msk [vmem:[%s245_s27] sm:$0xff] %vm253_vm0, %v353_v14 }
 0x113   : > { %678 = shalt.err (!%p675_p7)
}
 0x114   : > { %s679_s6 = scalar_lea.hbm %s910_s8, 256  ;;  %s683_s28 = scalar_lea.hbm %s964_s2, 512 }
 0x115   : > { %p680_p1 = scmp.ne.s32.totalorder %s910_s8, %s679_s6  ;;  %p684_p3 = scmp.lt.s32.totalorder %s910_s8, %s964_s2 }
 0x116   : > { %p685_p8 = scmp.lt.s32.totalorder %s683_s28, %s679_s6 }
 0x117   : > { %p681_p10 = pnand %p680_p1, %p825_p9 }
 0x118   : > { %p686_p0 = por %p685_p8, %p684_p3 }
 0x119   : > { %p682_p13 = pneg %p681_p10 }
 0x11b   : > { %p687_p2 = pnand %p686_p0, %p682_p13 }
 0x11d   : > { %690 = shalt.err (!%p687_p2)
}
 0x11e   : > { %s757_s19 = smov 128   ;;  %s758_s21 = smov 8  }
 0x11f   : > { %541 = dma.vmem_to_hbm [thread:$0]  (%p825_p9), %s912_s29, 256, %s910_s8, %s358_s12, %s757_s19, %s757_s19, %s758_s21  }
 0x120 PF: > { %s389_s27 = sand.u32 1, %s729_s9   ;;  %p551_p5 = pnand %p499_p12, %p832_p11 }
 0x121   : > { %s390_s3 = scalar_lea.sflag [#allocation5], %s389_s27 }
 0x122   : > { %p552_p6 = pneg %p551_p5 }
 0x124   : > { %724 = dma.done.wait (%p552_p6), %s390_s3, 256  }
 0x125   : > { %726 = vsyncadd (%p552_p6), %s390_s3, 4294967040  ;;  %s21_s14 = sadd.s32 1, %s749_s14   ;;  %s971_s9 = smov %s733_s10 }
 0x126   : > { %p18_p4 = scmp.ge.s32.totalorder %s21_s14, 4   ;;  %s972_s10 = smov %s737_s11 }
 0x127   : > { %s973_s11 = smov %s830_s23  ;;  %s974_s12 = smov %s745_s13 }
 0x128   : > { %s975_s13 = smov %s977_s17  ;;  %20 = sbr.rel (!%p18_p4) target bundleno = 8 (0x8), region = 94 }
 0x12d   :  { %395 = vsyncpa [#allocation4], 1 }
 0x12e   :  { %397 = vsyncpa [#allocation4 + $0x1], 1 }
 0x12f   :  { %398 = vsyncpa [#allocation7], 1 }
 0x130   :  { %400 = vsyncpa [#allocation7 + $0x1], 1 }
 0x131   :  { %401 = vsyncpa [#allocation5], 1 }
 0x132   :  { %403 = vsyncpa [#allocation5 + $0x1], 1 }

</bundles_post_ra>
